<compile_context>
chip_gen: v7x
topology: tpu7x:2x2x1
jax: 0.10.0
libtpu: 0.0.40
codegen_flags: <defaults>
</compile_context>

<pallas_src>
import functools

import numpy as np

import jax
import jax.numpy as jnp
from jax.experimental import pallas as pl
from jax.experimental.pallas import tpu as pltpu


_TARGET_TILE_BYTES = 8 << 20   # ~8 MiB x-tile per grid step
_MAX_STREAM_LANES = 16384      # cap streaming tile width (bounds slab unroll)


# --------------------------------------------------------------------------
# Static-exponent helpers
# --------------------------------------------------------------------------
def _static_uniform_half_p(p):
    """Return p as a Python float if it is concrete, identical for all
    channels, and 2*p is a small positive integer (covers the default p=3 and
    common half-integer exponents).  Otherwise return None (general path).

    NOTE: if gem() is traced under jit with `p` as a traced array this returns
    None and the general per-channel EUP pow path is used; pass p concretely
    (or as a static arg) to keep the fast path."""
    try:
        pv = np.asarray(p, dtype=np.float64)
    except Exception:
        return None
    if pv.size == 0:
        return None
    v = float(pv.flat[0])
    if not np.all(np.abs(pv - v) < 1e-12):
        return None
    k2 = round(2.0 * v)
    if 1 <= k2 <= 16 and abs(2.0 * v - k2) < 1e-12:
        return float(k2) / 2.0
    return None


def _int_pow(x, n):
    """x**n for small static integer n via square-and-multiply (pure VPU)."""
    result = None
    base = x
    while n:
        if n & 1:
            result = base if result is None else result * base
        n >>= 1
        if n:
            base = base * base
    return result


def _static_pow(xc, p_val):
    """x**p for a compile-time p that is a multiple of 0.5: VPU muls plus at
    most one sqrt (EUP) -- no log/exp in the hot loop."""
    k2 = int(round(2.0 * p_val))
    n, odd = divmod(k2, 2)
    out = _int_pow(xc, n) if n >= 1 else None
    if odd:
        s = jnp.sqrt(xc)
        out = s if out is None else out * s
    return out


def _static_root(m, p_val):
    """m ** (1/p) for static p (runs once per output element)."""
    if p_val == 1.0:
        return m
    if p_val == 2.0:
        return jnp.sqrt(m)
    if p_val == 0.5:
        return m * m
    return m ** (1.0 / p_val)


# --------------------------------------------------------------------------
# Kernels
# --------------------------------------------------------------------------
def _gem_kernel_single(*refs, eps, inv_hw, static_p):
    """One spatial tile per (batch*channel) tile -> no accumulator needed.
    refs = ([p_ref,] x_ref, o_ref)."""
    if static_p is None:
        p_ref, x_ref, o_ref = refs
    else:
        p_ref = None
        x_ref, o_ref = refs

    xc = jnp.maximum(x_ref[...].astype(jnp.float32), eps)          # (ct, hw)
    if static_p is None:
        xp = xc ** p_ref[...]                                      # EUP pow
    else:
        xp = _static_pow(xc, static_p)                             # VPU (+sqrt)

    m = jnp.sum(xp, axis=-1, keepdims=True) * inv_hw               # (ct, 1)
    if static_p is None:
        o = m ** (1.0 / p_ref[...])
    else:
        o = _static_root(m, static_p)
    o_ref[...] = o.astype(o_ref.dtype)


def _gem_kernel_multi(*refs, eps, inv_hw, static_p, hw, hwt, mask_lanes):
    """Streaming spatial tiles (huge H*W).  Partial sums live in a (ct, 128)
    f32 VMEM accumulator; the hot loop only does lane-aligned VPU slab adds,
    the single 128->1 XLU reduce happens in the finalize step.
    refs = ([p_ref,] x_ref, o_ref, acc_ref)."""
    if static_p is None:
        p_ref, x_ref, o_ref, acc_ref = refs
    else:
        p_ref = None
        x_ref, o_ref, acc_ref = refs

    k = pl.program_id(1)

    @pl.when(k == 0)
    def _init():
        acc_ref[...] = jnp.zeros_like(acc_ref)

    xc = jnp.maximum(x_ref[...].astype(jnp.float32), eps)          # (ct, hwt)
    if static_p is None:
        xp = xc ** p_ref[...]
    else:
        xp = _static_pow(xc, static_p)

    if mask_lanes:  # partial last spatial tile: zero out-of-range lanes
        col = k * hwt + jax.lax.broadcasted_iota(jnp.int32, xp.shape, 1)
        xp = jnp.where(col < hw, xp, 0.0)

    # Lane-aligned vreg slices -> pure VPU adds into the 128-wide accumulator.
    part = xp[:, 0:128]
    for s in range(1, hwt // 128):
        part = part + xp[:, s * 128:(s + 1) * 128]
    acc_ref[...] += part

    @pl.when(k == pl.num_programs(1) - 1)
    def _finalize():
        m = jnp.sum(acc_ref[...], axis=-1, keepdims=True) * inv_hw  # (ct, 1)
        if static_p is None:
            o = m ** (1.0 / p_ref[...])
        else:
            o = _static_root(m, static_p)
        o_ref[...] = o.astype(o_ref.dtype)


# --------------------------------------------------------------------------
# Tiling
# --------------------------------------------------------------------------
def _round_up(v, m):
    return (v + m - 1) // m * m


def _pick_tiles(bc, hw, itemsize, target_bytes):
    """Choose (ct, hwt).  Guarantees block shapes are either the full dim or
    (8, 128)-aligned, so they are legal for any B, C, H, W."""
    # Spatial (lane) tile: use the full dim whenever it fits the budget with
    # at least 8 rows -- always a legal block shape, no lane masking needed.
    if hw <= _MAX_STREAM_LANES or hw * 8 * itemsize <= target_bytes:
        hwt = hw
    else:
        hwt = max(128, min(_MAX_STREAM_LANES,
                           (target_bytes // (8 * itemsize)) // 128 * 128))

    # Row (batch*channel / sublane) tile from the remaining budget.
    rows = max(8, (target_bytes // max(1, hwt * itemsize)) // 8 * 8)
    if rows >= bc:
        # Whole BC axis fits in one block.  Split in two when each half stays
        # chunky (>=128 KiB) so the v7x megacore has >=2 parallel tiles.
        if bc >= 16 and (bc // 2) * hwt * itemsize >= (128 << 10):
            ct = _round_up((bc + 1) // 2, 8)
        else:
            ct = bc                       # full-dim block: legal for any bc
    else:
        ct = rows                         # multiple of 8 by construction
    return ct, hwt


def _padded_p(p, B, C, rows):
    """Per-row exponent for x2[r] = x[r // C, r % C]: tile p over B and pad
    with ones to the grid's row extent (tiny arrays, cheap)."""
    p_f32 = jnp.asarray(p, jnp.float32).reshape(C)
    p_bc = jnp.tile(p_f32, B)
    pad = rows - B * C
    if pad:
        p_bc = jnp.concatenate([p_bc, jnp.ones((pad,), jnp.float32)])
    return p_bc.reshape(rows, 1)


# --------------------------------------------------------------------------
# Public entry point
# --------------------------------------------------------------------------
def gem(x, p, eps=1e-6, *, target_tile_bytes=_TARGET_TILE_BYTES,
        _force_tiles=None):
    """GeM pooling.  x: (B, C, H, W); p: (C,) per-channel exponent -> (B, C)."""
    B, C, H, W = x.shape
    hw = H * W
    bc = B * C

    x2 = x.reshape(bc, hw)               # free, contiguous (no HBM transpose)

    static_p = _static_uniform_half_p(p)
    itemsize = jnp.dtype(x.dtype).itemsize
    if _force_tiles is not None:         # test hook (must be (8,128)-legal)
        ct, hwt = _force_tiles
    else:
        ct, hwt = _pick_tiles(bc, hw, itemsize, target_tile_bytes)
    nbc = -(-bc // ct)
    nk = -(-hw // hwt)

    inv_hw = 1.0 / float(hw)
    x_tile_bytes = ct * hwt * itemsize

    operands = []
    in_specs = []

    if nk == 1:
        grid = (nbc,)
        if static_p is None:
            operands.append(_padded_p(p, B, C, nbc * ct))
            in_specs.append(pl.BlockSpec((ct, 1), lambda i: (i, 0)))
        in_specs.append(pl.BlockSpec((ct, hwt), lambda i: (i, 0)))
        out_spec = pl.BlockSpec((ct, 1), lambda i: (i, 0))
        scratch = []
        kern = functools.partial(_gem_kernel_single, eps=float(eps),
                                 inv_hw=inv_hw, static_p=static_p)
        semantics = ("parallel",)
    else:
        grid = (nbc, nk)                 # reduction (spatial) axis last
        if static_p is None:
            operands.append(_padded_p(p, B, C, nbc * ct))
            in_specs.append(pl.BlockSpec((ct, 1), lambda i, k: (i, 0)))
        in_specs.append(pl.BlockSpec((ct, hwt), lambda i, k: (i, k)))
        out_spec = pl.BlockSpec((ct, 1), lambda i, k: (i, 0))
        scratch = [pltpu.VMEM((ct, 128), jnp.float32)]
        kern = functools.partial(_gem_kernel_multi, eps=float(eps),
                                 inv_hw=inv_hw, static_p=static_p,
                                 hw=hw, hwt=hwt,
                                 mask_lanes=(hw % hwt != 0))
        semantics = ("parallel", "arbitrary")

    operands.append(x2)

    if static_p is None:
        trans = 2 * bc * hw + bc
    elif static_p != float(int(static_p)):
        trans = bc * hw + bc             # one sqrt per element + final root
    else:
        trans = bc
    cost = pl.CostEstimate(
        flops=int(5 * bc * hw),
        transcendentals=int(trans),
        bytes_accessed=int(bc * hw * itemsize + bc * itemsize
                           + (bc * 4 if static_p is None else 0)),
    )

    out2 = pl.pallas_call(
        kern,
        out_shape=jax.ShapeDtypeStruct((bc, 1), x.dtype),
        grid=grid,
        in_specs=in_specs,
        out_specs=out_spec,
        scratch_shapes=scratch,
        compiler_params=pltpu.CompilerParams(
            dimension_semantics=semantics,
            vmem_limit_bytes=int(min(64 << 20,
                                     max(32 << 20,
                                         4 * x_tile_bytes + (8 << 20)))),
        ),
        cost_estimate=cost,
    )(*operands)

    return out2.reshape(B, C)


# --------------------------------------------------------------------------
# Reference + self-test
# --------------------------------------------------------------------------
def gem_reference(x, p, eps=1e-6):
    xc = jnp.maximum(x, eps)
    xp = xc ** p[None, :, None, None]
    m = jnp.mean(xp, axis=(2, 3))
    return m ** (1.0 / p)[None, :]


if __name__ == "__main__":
    eps = 1e-6

    # Small shapes consistent with the module's forward.
    B, C, H, W = 2, 4, 16, 16
    x = jax.random.normal(jax.random.PRNGKey(0), (B, C, H, W), jnp.float32)

    # 1) Module default init p = ones(C) * 3 -> static VPU-only fast path.
    p_def = jnp.ones((C,), jnp.float32) * 3.0
    out = jax.block_until_ready(gem(x, p_def, eps))
    ref = gem_reference(x, p_def, eps)
    assert out.shape == (B, C), out.shape
    assert jnp.allclose(out, ref, atol=1e-5, rtol=1e-4), (
        f"static-p path max abs err {jnp.max(jnp.abs(out - ref))}")

    # 2) Learned, non-uniform per-channel p -> general EUP pow path.
    p_gen = 2.5 + 0.25 * jnp.arange(C, dtype=jnp.float32)
    out = jax.block_until_ready(gem(x, p_gen, eps))
    ref = gem_reference(x, p_gen, eps)
    assert jnp.allclose(out, ref, atol=1e-5, rtol=1e-4), (
        f"general path max abs err {jnp.max(jnp.abs(out - ref))}")

    # 3) Awkward shape + forced small tiles: exercises the streaming path,
    #    lane masking, partial batch*channel tile and p padding.
    B3, C3, H3, W3 = 3, 5, 7, 23
    x3 = jax.random.normal(jax.random.PRNGKey(1), (B3, C3, H3, W3), jnp.float32)
    p3 = 2.0 + 0.5 * jnp.arange(C3, dtype=jnp.float32)   # non-uniform -> general
    out = jax.block_until_ready(gem(x3, p3, eps, _force_tiles=(8, 128)))
    ref = gem_reference(x3, p3, eps)
    assert jnp.allclose(out, ref, atol=1e-5, rtol=1e-4), (
        f"streaming general path max abs err {jnp.max(jnp.abs(out - ref))}")

    # 4) Uniform half-integer p on the streaming path (static sqrt fast path).
    p4 = jnp.full((C3,), 2.5, jnp.float32)
    out = jax.block_until_ready(gem(x3, p4, eps, _force_tiles=(8, 128)))
    ref = gem_reference(x3, p4, eps)
    assert jnp.allclose(out, ref, atol=1e-5, rtol=1e-4), (
        f"streaming static path max abs err {jnp.max(jnp.abs(out - ref))}")

    print("KERNEL_OK")
</pallas_src>

<mosaic_0001>
module attributes {stable_mosaic.version = 11 : i64} {
  func.func @_gem_kernel_single(%arg0: i32, %arg1: memref<8x256xf32, #tpu.memory_space<vmem>>, %arg2: memref<8x1xf32, #tpu.memory_space<vmem>>) attributes {dimension_semantics = [#tpu.dimension_semantics<parallel>], iteration_bounds = array<i64: 1>, scalar_prefetch = 0 : i64, scratch_operands = 0 : i64, tpu.core_type = #tpu.core_type<tc>, window_params = [{transform_indices = @transform_0, window_bounds = array<i64: 8, 256>}, {transform_indices = @transform_1, window_bounds = array<i64: 8, 1>}]} {
    %c0 = arith.constant 0 : index
    %c0_0 = arith.constant 0 : index
    %0 = vector.load %arg1[%c0, %c0_0] : memref<8x256xf32, #tpu.memory_space<vmem>>, vector<8x256xf32>
    %cst = arith.constant 9.99999997E-7 : f32
    %1 = vector.broadcast %cst : f32 to vector<8x256xf32>
    %2 = arith.maximumf %0, %1 : vector<8x256xf32>
    %3 = arith.mulf %2, %2 : vector<8x256xf32>
    %4 = arith.mulf %2, %3 : vector<8x256xf32>
    %cst_1 = arith.constant dense<0.000000e+00> : vector<8xf32>
    %5 = vector.multi_reduction <add>, %4, %cst_1 [1] : vector<8x256xf32> to vector<8xf32>
    %6 = vector.shape_cast %5 : vector<8xf32> to vector<8x1xf32>
    %cst_2 = arith.constant 3.906250e-03 : f32
    %7 = vector.broadcast %cst_2 : f32 to vector<8x1xf32>
    %8 = arith.mulf %6, %7 : vector<8x1xf32>
    %cst_3 = arith.constant 0.333333343 : f32
    %9 = vector.broadcast %cst_3 : f32 to vector<8x1xf32>
    %10 = math.powf %8, %9 : vector<8x1xf32>
    %c0_4 = arith.constant 0 : index
    %c0_5 = arith.constant 0 : index
    %11 = vector.load %arg2[%c0_4, %c0_5] : memref<8x1xf32, #tpu.memory_space<vmem>>, vector<8x1xf32>
    tpu.vector_store %arg2[%c0_4, %c0_5], %10 {strides = array<i32>} : memref<8x1xf32, #tpu.memory_space<vmem>>, vector<8x1xf32>,
    return
  }
  func.func @transform_0(%arg0: i32) -> (i32, i32) {
    %c0_i32 = arith.constant 0 : i32
    %c0_i32_0 = arith.constant 0 : i32
    return %arg0, %c0_i32 : i32, i32
  }
  func.func @transform_1(%arg0: i32) -> (i32, i32) {
    %c0_i32 = arith.constant 0 : i32
    %c0_i32_0 = arith.constant 0 : i32
    return %arg0, %c0_i32 : i32, i32
  }
}

</mosaic_0001>

<bundles_post_ra>
// kernel: tpu_custom_call.1
= control target key start
LH: loop header
LB: loop body
LE: loop exit
PB: predicated region body
PF: predicated region fallthrough
CT: control target
= control target key end

     0   :  { %6 = vsyncpa [#allocation3], 0  ;;  %s87_s6 = smov [#allocation2]   ;;  %s113_s0 = inlined_call_operand.hbm [shape: f32[8,256], index: 0, kind: input, shape index: {}]   ;;  %s114_s1 = inlined_call_operand.vmem [shape: f32[8,1], index: 1, kind: output, shape index: {}]  }
   0x1   :  { %s13_s7 = sshll.u32 %s87_s6, 4  ;;  %s63_s10 = scalar_lea.hbm %s113_s0, 256  ;;  %s14_s7 = int_to_ptr.vmem [resolvable:$true] %s13_s7 }
   0x2   :  { %p64_p0 = scmp.ne.s32.totalorder %s113_s0, %s63_s10  ;;  %p67_p1 = scmp.lt.u32.totalorder %s63_s10, %s113_s0 }
   0x4   :  { %p69_p2 = pnand %p67_p1, %p64_p0 }
   0x6   :  { %72 = shalt.err (!%p69_p2)
}
   0x7   :  { %s73_s15 = scalar_lea.vmem %s14_s7, 256  ;;  %p78_p4 = scmp.lt.s32.totalorder %s14_s7, %s14_s7 }
   0x8   :  { %p74_p3 = scmp.ne.s32.totalorder %s14_s7, %s73_s15  ;;  %p79_p5 = scmp.lt.s32.totalorder %s73_s15, %s73_s15 }
   0xa   :  { %p80_p6 = por %p79_p5, %p78_p4 }
   0xc   :  { %p81_p7 = pnand %p80_p6, %p74_p3 }
   0xe   :  { %84 = shalt.err (!%p81_p7)
}
   0xf   :  { %16 = dma.hbm_to_vmem [thread:$0]  %s113_s0, 256, %s14_s7, [#allocation3]  }
  0x10   :  { %85 = dma.done.wait [#allocation3], 256  }
  0x11   :  { %86 = vsyncadd [#allocation3], 4294967040  ;;  %v20_v0 = vld [vmem:[#allocation2] sm:$0xff]  ;;  %v21_v1 = vld [vmem:[#allocation2 + $0x8] sm:$0xff]  ;;  %vm33_vm4 = vcmask 7168  }
  0x12   :  { %v22_v2 = vmax.f32 %v20_v0, 1e-06  ;;  %v23_v3 = vmax.f32 %v21_v1, 1e-06 }
  0x14   :  { %v24_v4 = vmul.f32 %v22_v2, %v22_v2  ;;  %v25_v5 = vmul.f32 %v23_v3, %v23_v3 }
  0x16   :  { %v26_v6 = vmul.f32 %v24_v4, %v22_v2  ;;  %v27_v7 = vmul.f32 %v25_v5, %v23_v3 }
  0x18   :  { %v28_v8 = vadd.f32 %v27_v7, %v26_v6 }
  0x1a   :  { %29 = vadd.xlane.f32.xlu0 %v28_v8 }
  0xa7   :  { %v30_v9 = vpop.xlane.xlu0 %29 }
  0xa8   :  { %v31_v10 = vmul.f32 0.00390625, %v30_v9 }
  0xaa   :  { %v42_v11 = vand.u32 2147483647, %v31_v10  ;;  %v46_v14 = vand.u32 2147483648, %v31_v10  ;;  %vm41_vm2 = vcmp.lt.f32.partialorder %v31_v10, 0.0  ;;  %vm40_vm3 = vcmp.eq.f32.partialorder %v31_v10, 0.0 }
  0xac   :  { %59 = vlog2.f32 %v42_v11  ;;  %vm50_vm0 = vweird.f32 %v42_v11  ;;  %vm52_vm1 = vcmp.eq.f32.partialorder %v42_v11, 0.0  ;;  %vm43_vm5 = vcmp.eq.f32.partialorder %v42_v11, inf }
  0xb6   :  { %v60_v12 = vpop.eup %59 }
  0xb7   :  { %v47_v13 = vmul.f32 0.33333334, %v60_v12 }
  0xb9   :  { %61 = vpow2.f32 %v47_v13 }
  0xc3   :  { %v62_v15 = vpop.eup %61 }
  0xc4   :  { %v49_v16 = vor.u32 %v62_v15, %v46_v14 }
  0xc6   :  { %v51_v17 = vsel %vm50_vm0, %v31_v10, %v49_v16 }
  0xc7   :  { %v54_v18 = vsel %vm52_vm1, %v46_v14, %v51_v17 }
  0xc8   :  { %v55_v19 = vsel %vm41_vm2, nan, %v54_v18 }
  0xc9   :  { %v56_v20 = vsel %vm40_vm3, 0.0, %v55_v19 }
  0xca   :  { %v57_v21 = vsel %vm43_vm5, inf, %v56_v20 }
  0xcb   :  { %34 = vst.msk [vmem:[%s114_s1] sm:$0xff] %vm33_vm4, %v57_v21 }
  0xcc   :  { %39 = vsyncpa [#allocation3], 1 }

</bundles_post_ra>
